<compile_context>
chip_gen: v7x
topology: tpu7x:2x2x1
jax: 0.10.0
libtpu: 0.0.40
codegen_flags: <defaults>
</compile_context>

<pallas_src>
import jax
import jax.numpy as jnp
from jax.experimental import pallas as pl
from jax.experimental.pallas import tpu as pltpu

# ----------------------------- config (small) -------------------------------
BATCH = 2
SEQ = 8
HIDDEN = 32
INTERMEDIATE = 4 * HIDDEN   # 128 -> lane-dense intermediate activation


# ------------------------------ Pallas kernel -------------------------------
def clip_mlp_kernel(x_ref, w1_ref, b1_ref, w2_ref, b2_ref, o_ref):
    # x_ref : (M, H)    w1_ref : (H, I)   b1_ref : (1, I)
    # w2_ref: (I, H)    b2_ref : (1, H)   o_ref  : (M, H)
    x = x_ref[...]

    # fc1 (MXU) + bias (VPU) + sigmoid-approx GELU (VPU + EUP)
    h = jnp.dot(x, w1_ref[...], preferred_element_type=jnp.float32) + b1_ref[...]
    h = h * jax.nn.sigmoid(1.702 * h)

    # fc2 (MXU) + bias (VPU)
    out = jnp.dot(h, w2_ref[...], preferred_element_type=jnp.float32) + b2_ref[...]
    o_ref[...] = out.astype(o_ref.dtype)


# ------------------------------ wrapper --------------------------------------
def clip_mlp_forward(x, params):
    """x: (..., H) float32; params: torch-style
    {'w1': (I,H), 'b1': (I,), 'w2': (H,I), 'b2': (H,)}."""
    orig_shape = x.shape
    H = orig_shape[-1]
    x2 = x.reshape(-1, H)                 # fold batch+seq -> one (M, H) block
    M = x2.shape[0]

    # One-time wrapper-side layout prep (cheap XLA ops on tiny weights):
    w1t = params["w1"].T                  # (H, I): kernel does x @ w1t (no in-kernel .T)
    w2t = params["w2"].T                  # (I, H)
    b1 = params["b1"].reshape(1, -1)      # (1, I): 2-D for clean (sublane, lane) layout
    b2 = params["b2"].reshape(1, -1)      # (1, H)
    I = w1t.shape[1]

    out = pl.pallas_call(
        clip_mlp_kernel,
        out_shape=jax.ShapeDtypeStruct((M, H), x.dtype),
        grid_spec=pltpu.PrefetchScalarGridSpec(
            num_scalar_prefetch=0,
            grid=(1,),                    # single step: everything resident in VMEM
            in_specs=[
                pl.BlockSpec((M, H), lambda i: (0, 0)),
                pl.BlockSpec((H, I), lambda i: (0, 0)),
                pl.BlockSpec((1, I), lambda i: (0, 0)),
                pl.BlockSpec((I, H), lambda i: (0, 0)),
                pl.BlockSpec((1, H), lambda i: (0, 0)),
            ],
            out_specs=pl.BlockSpec((M, H), lambda i: (0, 0)),
        ),
        compiler_params=pltpu.CompilerParams(
            dimension_semantics=("arbitrary",)),
    )(x2, w1t, b1, w2t, b2)
    return out.reshape(orig_shape)


# ------------------------- pure-JAX reference --------------------------------
def _reference_mlp(x, p):
    h = x @ p["w1"].T + p["b1"]
    h = h * jax.nn.sigmoid(1.702 * h)
    return h @ p["w2"].T + p["b2"]


# ------------------------- deterministic init --------------------------------
def init_params(key):
    k1, k2, k3, k4 = jax.random.split(key, 4)
    # torch-style storage: (out_features, in_features)
    w1 = jax.random.normal(k1, (INTERMEDIATE, HIDDEN), jnp.float32) * 0.05
    b1 = jax.random.normal(k2, (INTERMEDIATE,), jnp.float32) * 0.02
    w2 = jax.random.normal(k3, (HIDDEN, INTERMEDIATE), jnp.float32) * 0.05
    b2 = jax.random.normal(k4, (HIDDEN,), jnp.float32) * 0.02
    return dict(w1=w1, b1=b1, w2=w2, b2=b2)


# ---------------------------------- main --------------------------------------
if __name__ == "__main__":
    root = jax.random.PRNGKey(0)
    kx, kp = jax.random.split(root)
    x = jax.random.normal(kx, (BATCH, SEQ, HIDDEN), jnp.float32)
    params = init_params(kp)

    fwd = jax.jit(clip_mlp_forward)       # avoid re-tracing on repeated calls
    out = fwd(x, params)
    out = jax.block_until_ready(out)

    ref = _reference_mlp(x, params)
    assert out.shape == (BATCH, SEQ, HIDDEN)
    assert jnp.allclose(out, ref, atol=1e-5, rtol=1e-5), (
        float(jnp.max(jnp.abs(out - ref))))

    print("KERNEL_OK")
</pallas_src>

<mosaic_0001>
module attributes {stable_mosaic.version = 11 : i64} {
  func.func @clip_mlp_kernel(%arg0: i32, %arg1: memref<16x32xf32, #tpu.memory_space<vmem>>, %arg2: memref<32x128xf32, #tpu.memory_space<vmem>>, %arg3: memref<1x128xf32, #tpu.memory_space<vmem>>, %arg4: memref<128x32xf32, #tpu.memory_space<vmem>>, %arg5: memref<1x32xf32, #tpu.memory_space<vmem>>, %arg6: memref<16x32xf32, #tpu.memory_space<vmem>>) attributes {dimension_semantics = [#tpu.dimension_semantics<arbitrary>], iteration_bounds = array<i64: 1>, scalar_prefetch = 0 : i64, scratch_operands = 0 : i64, tpu.core_type = #tpu.core_type<tc>, window_params = [{pipeline_mode = #tpu.pipeline_mode<synchronous>, transform_indices = @transform_0, window_bounds = array<i64: 16, 32>}, {pipeline_mode = #tpu.pipeline_mode<synchronous>, transform_indices = @transform_1, window_bounds = array<i64: 32, 128>}, {pipeline_mode = #tpu.pipeline_mode<synchronous>, transform_indices = @transform_2, window_bounds = array<i64: 1, 128>}, {pipeline_mode = #tpu.pipeline_mode<synchronous>, transform_indices = @transform_3, window_bounds = array<i64: 128, 32>}, {pipeline_mode = #tpu.pipeline_mode<synchronous>, transform_indices = @transform_4, window_bounds = array<i64: 1, 32>}, {pipeline_mode = #tpu.pipeline_mode<synchronous>, transform_indices = @transform_5, window_bounds = array<i64: 16, 32>}]} {
    %c0 = arith.constant 0 : index
    %c0_0 = arith.constant 0 : index
    %0 = vector.load %arg1[%c0, %c0_0] : memref<16x32xf32, #tpu.memory_space<vmem>>, vector<16x32xf32>
    %c0_1 = arith.constant 0 : index
    %c0_2 = arith.constant 0 : index
    %1 = vector.load %arg2[%c0_1, %c0_2] : memref<32x128xf32, #tpu.memory_space<vmem>>, vector<32x128xf32>
    %cst = arith.constant dense<0.000000e+00> : vector<16x128xf32>
    %2 = tpu.matmul %0, %1, %cst {dimension_numbers = #tpu.dot_dimension_numbers<[1], [0], [0], [1], [0, 0, 1, 1], [], []>} : vector<16x32xf32>, vector<32x128xf32>, vector<16x128xf32> -> vector<16x128xf32>
    %c0_3 = arith.constant 0 : index
    %c0_4 = arith.constant 0 : index
    %3 = vector.load %arg3[%c0_3, %c0_4] : memref<1x128xf32, #tpu.memory_space<vmem>>, vector<1x128xf32>
    %4 = vector.broadcast %3 : vector<1x128xf32> to vector<16x128xf32>
    %5 = arith.addf %2, %4 : vector<16x128xf32>
    %cst_5 = arith.constant 1.702000e+00 : f32
    %6 = vector.broadcast %cst_5 : f32 to vector<16x128xf32>
    %7 = arith.mulf %6, %5 : vector<16x128xf32>
    %8 = arith.negf %7 : vector<16x128xf32>
    %9 = math.exp %8 : vector<16x128xf32>
    %cst_6 = arith.constant 1.000000e+00 : f32
    %10 = vector.broadcast %cst_6 : f32 to vector<16x128xf32>
    %11 = arith.addf %10, %9 : vector<16x128xf32>
    %12 = arith.divf %10, %11 : vector<16x128xf32>
    %13 = arith.mulf %5, %12 : vector<16x128xf32>
    %c0_7 = arith.constant 0 : index
    %c0_8 = arith.constant 0 : index
    %14 = vector.load %arg4[%c0_7, %c0_8] : memref<128x32xf32, #tpu.memory_space<vmem>>, vector<128x32xf32>
    %cst_9 = arith.constant dense<0.000000e+00> : vector<16x32xf32>
    %15 = tpu.matmul %13, %14, %cst_9 {dimension_numbers = #tpu.dot_dimension_numbers<[1], [0], [0], [1], [0, 0, 1, 1], [], []>} : vector<16x128xf32>, vector<128x32xf32>, vector<16x32xf32> -> vector<16x32xf32>
    %c0_10 = arith.constant 0 : index
    %c0_11 = arith.constant 0 : index
    %16 = vector.load %arg5[%c0_10, %c0_11] : memref<1x32xf32, #tpu.memory_space<vmem>>, vector<1x32xf32>
    %17 = vector.broadcast %16 : vector<1x32xf32> to vector<16x32xf32>
    %18 = arith.addf %15, %17 : vector<16x32xf32>
    %c0_12 = arith.constant 0 : index
    %c0_13 = arith.constant 0 : index
    %19 = vector.load %arg6[%c0_12, %c0_13] : memref<16x32xf32, #tpu.memory_space<vmem>>, vector<16x32xf32>
    tpu.vector_store %arg6[%c0_12, %c0_13], %18 {strides = array<i32>} : memref<16x32xf32, #tpu.memory_space<vmem>>, vector<16x32xf32>,
    return
  }
  func.func @transform_0(%arg0: i32) -> (i32, i32) {
    %c0_i32 = arith.constant 0 : i32
    %c0_i32_0 = arith.constant 0 : i32
    %c0_i32_1 = arith.constant 0 : i32
    return %c0_i32, %c0_i32_0 : i32, i32
  }
  func.func @transform_1(%arg0: i32) -> (i32, i32) {
    %c0_i32 = arith.constant 0 : i32
    %c0_i32_0 = arith.constant 0 : i32
    %c0_i32_1 = arith.constant 0 : i32
    return %c0_i32, %c0_i32_0 : i32, i32
  }
  func.func @transform_2(%arg0: i32) -> (i32, i32) {
    %c0_i32 = arith.constant 0 : i32
    %c0_i32_0 = arith.constant 0 : i32
    %c0_i32_1 = arith.constant 0 : i32
    return %c0_i32, %c0_i32_0 : i32, i32
  }
  func.func @transform_3(%arg0: i32) -> (i32, i32) {
    %c0_i32 = arith.constant 0 : i32
    %c0_i32_0 = arith.constant 0 : i32
    %c0_i32_1 = arith.constant 0 : i32
    return %c0_i32, %c0_i32_0 : i32, i32
  }
  func.func @transform_4(%arg0: i32) -> (i32, i32) {
    %c0_i32 = arith.constant 0 : i32
    %c0_i32_0 = arith.constant 0 : i32
    %c0_i32_1 = arith.constant 0 : i32
    return %c0_i32, %c0_i32_0 : i32, i32
  }
  func.func @transform_5(%arg0: i32) -> (i32, i32) {
    %c0_i32 = arith.constant 0 : i32
    %c0_i32_0 = arith.constant 0 : i32
    %c0_i32_1 = arith.constant 0 : i32
    return %c0_i32, %c0_i32_0 : i32, i32
  }
}

</mosaic_0001>

<bundles_post_ra>
// kernel: clip_mlp_forward.1
= control target key start
LH: loop header
LB: loop body
LE: loop exit
PB: predicated region body
PF: predicated region fallthrough
CT: control target
= control target key end

     0   :  { %vm34_vm0 = vcmask 261120   ;;  %s520_s0 = inlined_call_operand.vmem [shape: f32[16,32], index: 0, kind: input, shape index: {}]   ;;  %s521_s1 = inlined_call_operand.vmem [shape: f32[32,128], index: 1, kind: input, shape index: {}]   ;;  %s522_s2 = inlined_call_operand.vmem [shape: f32[1,128], index: 2, kind: input, shape index: {}]   ;;  %s523_s3 = inlined_call_operand.vmem [shape: f32[128,32], index: 3, kind: input, shape index: {}]   ;;  %s524_s4 = inlined_call_operand.vmem [shape: f32[1,32], index: 4, kind: input, shape index: {}]   ;;  %s525_s5 = inlined_call_operand.hbm [shape: f32[16,32], index: 5, kind: output, shape index: {}]  }
   0x1   :  { %v23_v0 = vld [vmem:[%s521_s1] sm:$0xff]  ;;  %v24_v1 = vld [vmem:[%s521_s1 + $0x8] sm:$0xff]  ;;  %v25_v2 = vld [vmem:[%s521_s1 + $0x10] sm:$0xff] }
   0x2   :  { %v324_v3 = vpack.c.bf16 %v24_v1, %v23_v0  ;;  %v26_v4 = vld [vmem:[%s521_s1 + $0x18] sm:$0xff]  ;;  %v21_v5 = vld [vmem:[%s520_s0] sm:$0xff] }
   0x3   :  { %v328_v6 = vpack.c.bf16 %v26_v4, %v25_v2  ;;  %286 = vmatprep.mubr.msk.f32.mxu0 %vm34_vm0, %v21_v5 }
   0x4   :  { %10 = vsyncpa [#allocation3], 0  ;;  %325 = vmatprep.subr.bf16.mxu0 %v324_v3  ;;  %v22_v7 = vld [vmem:[%s520_s0 + $0x8] sm:$0xff]  ;;  %v132_v8 = vld [vmem:[%s523_s3] sm:$0xff]  ;;  %s399_s11 = smov [#allocation2]  }
   0x5   :  { %327 = vmatpush3.bf16.msra.mxu0 %v324_v3  ;;  %v133_v9 = vld [vmem:[%s523_s3 + $0x8] sm:$0xff]  ;;  %v134_v11 = vld [vmem:[%s523_s3 + $0x10] sm:$0xff]  ;;  %v135_v12 = vld [vmem:[%s523_s3 + $0x18] sm:$0xff]  ;;  %s237_s0 = sshll.u32 %s399_s11, 4  ;;  %s238_s0 = int_to_ptr.vmem [resolvable:$true] %s237_s0 }
   0x6   :  { %329 = vmatprep.subr.bf16.mxu0 %v328_v6  ;;  %v332_v10 = vpack.c.bf16 %v133_v9, %v132_v8  ;;  %v336_v13 = vpack.c.bf16 %v135_v12, %v134_v11  ;;  %v136_v14 = vld [vmem:[%s523_s3 + $0x20] sm:$0xff]  ;;  %v137_v15 = vld [vmem:[%s523_s3 + $0x28] sm:$0xff]  ;;  %v138_v17 = vld [vmem:[%s523_s3 + $0x30] sm:$0xff]  ;;  %s375_s12 = scalar_lea.vmem %s238_s0, 256  ;;  %p380_p1 = scmp.lt.s32.totalorder %s238_s0, %s238_s0 }
   0x7   :  { %v340_v16 = vpack.c.bf16 %v137_v15, %v136_v14  ;;  %v139_v18 = vld [vmem:[%s523_s3 + $0x38] sm:$0xff]  ;;  %v140_v20 = vld [vmem:[%s523_s3 + $0x40] sm:$0xff]  ;;  %v141_v21 = vld [vmem:[%s523_s3 + $0x48] sm:$0xff]  ;;  %p376_p0 = scmp.ne.s32.totalorder %s238_s0, %s375_s12  ;;  %p381_p2 = scmp.lt.s32.totalorder %s375_s12, %s375_s12 }
   0x8   :  { %333 = vmatprep.subr.bf16.mxu1 %v332_v10  ;;  %v344_v19 = vpack.c.bf16 %v139_v18, %v138_v17  ;;  %v348_v22 = vpack.c.bf16 %v141_v21, %v140_v20  ;;  %v142_v23 = vld [vmem:[%s523_s3 + $0x50] sm:$0xff]  ;;  %v143_v24 = vld [vmem:[%s523_s3 + $0x58] sm:$0xff]  ;;  %v144_v26 = vld [vmem:[%s523_s3 + $0x60] sm:$0xff] }
   0x9   :  { %331 = vmatpush3.bf16.msra.mxu0 %v328_v6  ;;  %335 = vmatpush3.bf16.msra.mxu1 %v332_v10  ;;  %v352_v25 = vpack.c.bf16 %v143_v24, %v142_v23  ;;  %v145_v27 = vld [vmem:[%s523_s3 + $0x68] sm:$0xff]  ;;  %v146_v29 = vld [vmem:[%s523_s3 + $0x70] sm:$0xff]  ;;  %v147_v30 = vld [vmem:[%s523_s3 + $0x78] sm:$0xff]  ;;  %p382_p3 = por %p381_p2, %p380_p1 }
   0xa   :  { %337 = vmatprep.subr.bf16.mxu1 %v336_v13  ;;  %v356_v28 = vpack.c.bf16 %v145_v27, %v144_v26  ;;  %v360_v31 = vpack.c.bf16 %v147_v30, %v146_v29  ;;  %v248_v32 = vld [vmem:[%s522_s2] ss:$0 sm:$0xff] }
   0xb   :  { %v253_v49 = vld [vmem:[%s524_s4] ss:$0 sm:$0xff]  ;;  %p383_p4 = pnand %p382_p3, %p376_p0 }
   0xc   :  { %287 = vmatmul.mubr.msk.f32.vlgmr.msra.gmra.mrb[0].mxu0 %vm34_vm0, %v22_v7 }
   0xd   :  { %339 = vmatpush3.bf16.msra.mxu1 %v336_v13 }
   0xe   :  { %341 = vmatprep.subr.bf16.mxu1 %v340_v16 }
  0x11   :  { %343 = vmatpush3.bf16.msra.mxu1 %v340_v16 }
  0x12   :  { %345 = vmatprep.subr.bf16.mxu1 %v344_v19 }
  0x15   :  { %347 = vmatpush3.bf16.msra.mxu1 %v344_v19 }
  0x16   :  { %349 = vmatprep.subr.bf16.mxu1 %v348_v22 }
  0x19   :  { %351 = vmatpush3.bf16.msra.mxu1 %v348_v22 }
  0x1a   :  { %353 = vmatprep.subr.bf16.mxu1 %v352_v25 }
  0x1d   :  { %355 = vmatpush3.bf16.msra.mxu1 %v352_v25 }
  0x1e   :  { %357 = vmatprep.subr.bf16.mxu1 %v356_v28 }
  0x21   :  { %359 = vmatpush3.bf16.msra.mxu1 %v356_v28 }
  0x22   :  { %361 = vmatprep.subr.bf16.mxu1 %v360_v31 }
  0x25   :  { %363 = vmatpush3.bf16.msra.mxu1 %v360_v31 }
  0xdf   :  { %v288_v33 = vpop.f32.mrb[0].mxu0 }
  0xe0   :  { %v113_v34 = vadd.f32 %v288_v33, %v248_v32  ;;  %v107_v35 = vpop.f32.mrb[1].mxu0 }
  0xe1   :  { %v108_v36 = vadd.f32 %v248_v32, %v107_v35 }
  0xe2   :  { %v252_v37 = vmul.f32 -1.702, %v113_v34 }
  0xe3   :  { %v251_v38 = vmul.f32 -1.702, %v108_v36 }
  0xe4   :  { %v122_v39 = vmul.f32 1.442695, %v252_v37 }
  0xe5   :  { %v120_v40 = vmul.f32 1.442695, %v251_v38 }
  0xe6   :  { %367 = vpow2.f32 %v122_v39 }
  0xe7   :  { %369 = vpow2.f32 %v120_v40 }
  0xf0   :  { %v368_v41 = vpop.eup %367 }
  0xf1   :  { %v370_v42 = vpop.eup %369  ;;  %v125_v43 = vadd.f32 1.0, %v368_v41 }
  0xf2   :  { %v124_v44 = vadd.f32 1.0, %v370_v42 }
  0xf3   :  { %371 = vrcp.f32 %v125_v43 }
  0xf4   :  { %373 = vrcp.f32 %v124_v44 }
  0xfd   :  { %v372_v45 = vpop.eup %371 }
  0xfe   :  { %v374_v46 = vpop.eup %373  ;;  %v131_v48 = vmul.f32 %v372_v45, %v113_v34 }
  0xff   :  { %v130_v47 = vmul.f32 %v374_v46, %v108_v36 }
 0x101   :  { %321 = vmatprep.mubr.f32.mxu1 %v130_v47 }
 0x102   :  { %322 = vmatmul.mubr.f32.vlgmr.msra.gmra.mrb[0].mxu1 %v131_v48 }
 0x1d5   :  { %v323_v50 = vpop.f32.mrb[0].mxu1 }
 0x1d6   :  { %v227_v51 = vadd.f32 %v323_v50, %v253_v49  ;;  %v221_v52 = vpop.f32.mrb[1].mxu1 }
 0x1d7   :  { %v222_v53 = vadd.f32 %v253_v49, %v221_v52 }
 0x1d8   :  { %231 = vst.msk [vmem:[#allocation2 + $0x8] sm:$0xff] %vm34_vm0, %v227_v51 }
 0x1d9   :  { %230 = vst.msk [vmem:[#allocation2] sm:$0xff] %vm34_vm0, %v222_v53 }
 0x1da   :  { %386 = shalt.err (!%p383_p4)
}
 0x1db   :  { %s387_s14 = scalar_lea.hbm %s525_s5, 256 }
 0x1dc   :  { %p388_p5 = scmp.ne.s32.totalorder %s525_s5, %s387_s14  ;;  %p391_p6 = scmp.lt.u32.totalorder %s387_s14, %s525_s5 }
 0x1de   :  { %p393_p7 = pnand %p391_p6, %p388_p5 }
 0x1e0   :  { %396 = shalt.err (!%p393_p7)
}
 0x1e1   :  { %s400_s19 = smov 128   ;;  %s401_s20 = smov 8  }
 0x1e2   :  { %243 = dma.vmem_to_hbm [thread:$0]  %s238_s0, 256, %s525_s5, [#allocation3], %s400_s19, %s400_s19, %s401_s20  }
 0x1e3   :  { %397 = dma.done.wait [#allocation3], 256  }
 0x1e4   :  { %398 = vsyncadd [#allocation3], 4294967040 }
 0x1e5   :  { %247 = vsyncpa [#allocation3], 1 }

</bundles_post_ra>
